<compile_context>
chip_gen: v5e
topology: v5e:2x2
jax: 0.10.0
libtpu: 0.0.40
codegen_flags: <defaults>
</compile_context>

<pallas_src>
import functools

import jax
import jax.numpy as jnp
from jax.experimental import pallas as pl
from jax.experimental.pallas import tpu as pltpu

K = 3  # MaxPool2d(3): kernel_size == stride == 3, padding == 0, ceil_mode=True


def _ceil_out(n: int) -> int:
    # PyTorch ceil_mode output size for kernel = stride = 3, padding = 0.
    return -(-(n - K) // K) + 1


def _maxpool_kernel(x_ref, o_ref, *, H, W, oh, ow, bc):
    hp, wp = K * oh, K * ow            # padded extents (overhang <= 2 each)
    pad_h, pad_w = hp - H, wp - W

    x = x_ref[...]                     # (bc, H, W), input dtype

    # ---------------- W direction (lanes) ----------------
    # Edge-replicate the ceil_mode overhang (duplicates never change a max).
    if pad_w:
        x = jnp.concatenate([x] + [x[:, :, W - 1:W]] * pad_w, axis=2)    # (bc, H, wp)
    # 3-wide running max at every start column: contiguous shifted slices (VPU).
    xw = jnp.maximum(jnp.maximum(x[:, :, 0:wp - 2], x[:, :, 1:wp - 1]),
                     x[:, :, 2:wp])                                      # (bc, H, wp-2)
    # Keep start columns 0, 3, ..., 3*(ow-1): one-hot selection matmul (MXU).
    jj = jax.lax.broadcasted_iota(jnp.int32, (bc, wp - 2, ow), 1)
    cc = jax.lax.broadcasted_iota(jnp.int32, (bc, wp - 2, ow), 2)
    sel_w = (jj == K * cc).astype(jnp.float32)
    cw = jnp.einsum("bhj,bjc->bhc", xw.astype(jnp.float32), sel_w,
                    preferred_element_type=jnp.float32)                  # (bc, H, ow)

    # ---------------- H direction (sublanes) ----------------
    if pad_h:
        cw = jnp.concatenate([cw] + [cw[:, H - 1:H, :]] * pad_h, axis=1)  # (bc, hp, ow)
    hm = jnp.maximum(jnp.maximum(cw[:, 0:hp - 2, :], cw[:, 1:hp - 1, :]),
                     cw[:, 2:hp, :])                                     # (bc, hp-2, ow)
    rr = jax.lax.broadcasted_iota(jnp.int32, (bc, oh, hp - 2), 1)
    kk = jax.lax.broadcasted_iota(jnp.int32, (bc, oh, hp - 2), 2)
    sel_h = (kk == K * rr).astype(jnp.float32)
    out = jnp.einsum("brk,bkc->brc", sel_h, hm,
                     preferred_element_type=jnp.float32)                 # (bc, oh, ow)

    o_ref[...] = out.astype(o_ref.dtype)


def maxpool2d_ceil(x, *, target_block_bytes=4 * 1024 * 1024):
    """MaxPool2d(3, ceil_mode=True) on an NCHW tensor via one Pallas TPU kernel."""
    if not jnp.issubdtype(x.dtype, jnp.floating):
        # TODO(synk): integer dtypes would need an integer-exact compaction path.
        raise NotImplementedError("maxpool2d_ceil: floating-point inputs only")

    N, C, H, W = x.shape
    oh, ow = _ceil_out(H), _ceil_out(W)
    NC = N * C

    # Tile over the fused N*C axis: cap the input block size (VMEM budget,
    # double-buffered) and keep >=2 grid steps so v7x can use both TensorCores.
    itemsize = jnp.dtype(x.dtype).itemsize
    bc = max(1, min(NC, target_block_bytes // max(1, H * W * itemsize)))
    if NC >= 2:
        bc = min(bc, -(-NC // 2))
    grid = (pl.cdiv(NC, bc),)
    # TODO(synk): for extremely large single images (H*W plane >> VMEM), add a
    # second grid axis over 3-row-aligned output-row tiles.

    kernel = functools.partial(_maxpool_kernel, H=H, W=W, oh=oh, ow=ow, bc=bc)

    out = pl.pallas_call(
        kernel,
        out_shape=jax.ShapeDtypeStruct((NC, oh, ow), x.dtype),
        grid=grid,
        in_specs=[pl.BlockSpec((bc, H, W), lambda g: (g, 0, 0))],
        out_specs=pl.BlockSpec((bc, oh, ow), lambda g: (g, 0, 0)),
        compiler_params=pltpu.CompilerParams(
            dimension_semantics=("parallel",),
            vmem_limit_bytes=32 * 1024 * 1024,
        ),
    )(x.reshape(NC, H, W))
    return out.reshape(N, C, oh, ow)


if __name__ == "__main__":
    # Mynn has no learned parameters (pure max-pool), so nothing to initialize.
    key = jax.random.PRNGKey(0)
    x = jax.random.normal(key, (2, 4, 16, 16), dtype=jnp.float32)

    y = jax.jit(maxpool2d_ceil)(x)
    y = jax.block_until_ready(y)

    # Pure-JAX reference with the same ceil_mode semantics.
    N, C, H, W = x.shape
    oh, ow = _ceil_out(H), _ceil_out(W)
    xp = jnp.pad(
        x,
        ((0, 0), (0, 0), (0, oh * K - H), (0, ow * K - W)),
        constant_values=float("-inf"),
    )
    ref = jnp.max(xp.reshape(N, C, oh, K, ow, K), axis=(3, 5))

    assert y.shape == (N, C, oh, ow), (y.shape, (N, C, oh, ow))
    assert jnp.allclose(y, ref), "Pallas maxpool mismatch vs reference"
    print("KERNEL_OK")
</pallas_src>

<mosaic_0001>
module attributes {stable_mosaic.version = 11 : i64} {
  func.func @_maxpool_kernel(%arg0: i32, %arg1: memref<4x16x16xf32, #tpu.memory_space<vmem>>, %arg2: memref<4x6x6xf32, #tpu.memory_space<vmem>>) attributes {dimension_semantics = [#tpu.dimension_semantics<parallel>], iteration_bounds = array<i64: 2>, scalar_prefetch = 0 : i64, scratch_operands = 0 : i64, tpu.core_type = #tpu.core_type<tc>, window_params = [{transform_indices = @transform_0, window_bounds = array<i64: 4, 16, 16>}, {transform_indices = @transform_1, window_bounds = array<i64: 4, 6, 6>}]} {
    %c0 = arith.constant 0 : index
    %c0_0 = arith.constant 0 : index
    %c0_1 = arith.constant 0 : index
    %0 = vector.load %arg1[%c0, %c0_0, %c0_1] : memref<4x16x16xf32, #tpu.memory_space<vmem>>, vector<4x16x16xf32>
    %1 = vector.extract_strided_slice %0 {offsets = [0, 0, 15], sizes = [4, 16, 1], strides = [1, 1, 1]} : vector<4x16x16xf32> to vector<4x16x1xf32>
    %2 = tpu.concatenate %0, %1, %1 in 2 : vector<4x16x16xf32>, vector<4x16x1xf32>, vector<4x16x1xf32> -> vector<4x16x18xf32>
    %3 = vector.extract_strided_slice %2 {offsets = [0, 0, 0], sizes = [4, 16, 16], strides = [1, 1, 1]} : vector<4x16x18xf32> to vector<4x16x16xf32>
    %4 = vector.extract_strided_slice %2 {offsets = [0, 0, 1], sizes = [4, 16, 16], strides = [1, 1, 1]} : vector<4x16x18xf32> to vector<4x16x16xf32>
    %5 = arith.maximumf %3, %4 : vector<4x16x16xf32>
    %6 = vector.extract_strided_slice %2 {offsets = [0, 0, 2], sizes = [4, 16, 16], strides = [1, 1, 1]} : vector<4x16x18xf32> to vector<4x16x16xf32>
    %7 = arith.maximumf %5, %6 : vector<4x16x16xf32>
    %8 = tpu.iota {dimensions = array<i32: 1>} : vector<4x16x6xi32>
    %9 = tpu.iota {dimensions = array<i32: 2>} : vector<4x16x6xi32>
    %c3_i32 = arith.constant 3 : i32
    %10 = vector.broadcast %c3_i32 : i32 to vector<4x16x6xi32>
    %11 = arith.muli %10, %9 : vector<4x16x6xi32>
    %12 = arith.cmpi eq, %8, %11 : vector<4x16x6xi32>
    %13 = arith.extui %12 : vector<4x16x6xi1> to vector<4x16x6xi32>
    %14 = arith.sitofp %13 : vector<4x16x6xi32> to vector<4x16x6xf32>
    "tpu.trace_start"() <{level = 10 : i32, message = "bhj,bjc->bhc"}> : () -> ()
    %cst = arith.constant dense<0.000000e+00> : vector<4x16x6xf32>
    %15 = tpu.matmul %7, %14, %cst {dimension_numbers = #tpu.dot_dimension_numbers<[2], [1], [1], [2], [0, 0, 0, 1, 1, 2], [0], [0]>} : vector<4x16x16xf32>, vector<4x16x6xf32>, vector<4x16x6xf32> -> vector<4x16x6xf32>
    "tpu.trace_stop"() : () -> ()
    %16 = vector.extract_strided_slice %15 {offsets = [0, 15, 0], sizes = [4, 1, 6], strides = [1, 1, 1]} : vector<4x16x6xf32> to vector<4x1x6xf32>
    %17 = tpu.concatenate %15, %16, %16 in 1 : vector<4x16x6xf32>, vector<4x1x6xf32>, vector<4x1x6xf32> -> vector<4x18x6xf32>
    %18 = vector.extract_strided_slice %17 {offsets = [0, 0, 0], sizes = [4, 16, 6], strides = [1, 1, 1]} : vector<4x18x6xf32> to vector<4x16x6xf32>
    %19 = vector.extract_strided_slice %17 {offsets = [0, 1, 0], sizes = [4, 16, 6], strides = [1, 1, 1]} : vector<4x18x6xf32> to vector<4x16x6xf32>
    %20 = arith.maximumf %18, %19 : vector<4x16x6xf32>
    %21 = vector.extract_strided_slice %17 {offsets = [0, 2, 0], sizes = [4, 16, 6], strides = [1, 1, 1]} : vector<4x18x6xf32> to vector<4x16x6xf32>
    %22 = arith.maximumf %20, %21 : vector<4x16x6xf32>
    %23 = tpu.iota {dimensions = array<i32: 1>} : vector<4x6x16xi32>
    %24 = tpu.iota {dimensions = array<i32: 2>} : vector<4x6x16xi32>
    %c3_i32_2 = arith.constant 3 : i32
    %25 = vector.broadcast %c3_i32_2 : i32 to vector<4x6x16xi32>
    %26 = arith.muli %25, %23 : vector<4x6x16xi32>
    %27 = arith.cmpi eq, %24, %26 : vector<4x6x16xi32>
    %28 = arith.extui %27 : vector<4x6x16xi1> to vector<4x6x16xi32>
    %29 = arith.sitofp %28 : vector<4x6x16xi32> to vector<4x6x16xf32>
    "tpu.trace_start"() <{level = 10 : i32, message = "brk,bkc->brc"}> : () -> ()
    %cst_3 = arith.constant dense<0.000000e+00> : vector<4x6x6xf32>
    %30 = tpu.matmul %29, %22, %cst_3 {dimension_numbers = #tpu.dot_dimension_numbers<[2], [1], [1], [2], [0, 0, 0, 1, 1, 2], [0], [0]>} : vector<4x6x16xf32>, vector<4x16x6xf32>, vector<4x6x6xf32> -> vector<4x6x6xf32>
    "tpu.trace_stop"() : () -> ()
    %c0_4 = arith.constant 0 : index
    %c0_5 = arith.constant 0 : index
    %c0_6 = arith.constant 0 : index
    %31 = vector.load %arg2[%c0_4, %c0_5, %c0_6] : memref<4x6x6xf32, #tpu.memory_space<vmem>>, vector<4x6x6xf32>
    tpu.vector_store %arg2[%c0_4, %c0_5, %c0_6], %30 {strides = array<i32>} : memref<4x6x6xf32, #tpu.memory_space<vmem>>, vector<4x6x6xf32>,
    return
  }
  func.func @transform_0(%arg0: i32) -> (i32, i32, i32) {
    %c0_i32 = arith.constant 0 : i32
    %c0_i32_0 = arith.constant 0 : i32
    %c0_i32_1 = arith.constant 0 : i32
    return %arg0, %c0_i32, %c0_i32_0 : i32, i32, i32
  }
  func.func @transform_1(%arg0: i32) -> (i32, i32, i32) {
    %c0_i32 = arith.constant 0 : i32
    %c0_i32_0 = arith.constant 0 : i32
    %c0_i32_1 = arith.constant 0 : i32
    return %arg0, %c0_i32, %c0_i32_0 : i32, i32, i32
  }
}

</mosaic_0001>

<bundles_post_ra>
// kernel: maxpool2d_ceil.1
= control target key start
LH: loop header
LB: loop body
LE: loop exit
PB: predicated region body
PF: predicated region fallthrough
CT: control target
= control target key end

     0   :  { %6 = vsyncpa [#allocation3], 0  ;;  %s1040_s0 = inlined_call_operand.hbm [shape: f32[8,16,16], index: 0, kind: input, shape index: {}]   ;;  %s1041_s1 = inlined_call_operand.vmem [shape: f32[8,6,6], index: 1, kind: output, shape index: {}]  }
   0x1   :  { %8 = vsyncpa [#allocation3 + $0x1], 0  ;;  %s860_s6 = smov 0   ;;  %s862_s7 = smov 0  }
   0x2   :  { %s864_s8 = smov 0   ;;  %s866_s9 = smov 0  }
   0x3 LB: > { %s690_s10 = sadd.s32 4294967295, %s840_s9   ;;  %s880_s11 = sadd.s32 1, %s840_s9   ;;  %s840_s9 = sphi %s866_s9, %s1048_s9   ;;  %s836_s8 = sphi %s864_s8, %s1047_s8   ;;  %s832_s7 = sphi %s862_s7, %s1046_s7   ;;  %s828_s6 = sphi %s860_s6, %s1045_s6  }
   0x4   : > { %s18_s12 = ssub.s32 %s840_s9, %s880_s11  ;;  %s21_s13 = sadd.s32 1, %s836_s8 }
   0x5   : > { %p19_p0 = scmp.eq.s32.totalorder %s18_s12, 0  ;;  %p28_p1 = scmp.ne.s32.totalorder %s836_s8, %s832_s7 }
   0x6   : > { %p29_p2 = scmp.eq.s32.totalorder %s840_s9, 0  ;;  %p34_p3 = scmp.ne.s32.totalorder %s832_s7, %s828_s6 }
   0x7   : > { %s890_s14 = scalar_select %p19_p0, %s836_s8, %s21_s13  }
   0x8   : > { %p892_p4 = por %p29_p2, %p28_p1  ;;  %p35_p5 = scmp.eq.s32.totalorder %s690_s10, 0 }
   0x9   : > { %p735_p6 = scmp.lt.s32.totalorder %s840_s9, 2  ;;  %s84_s17 = sand.u32 1, %s836_s8  }
   0xa   : > { %p899_p7 = por %p35_p5, %p34_p3  ;;  %s694_s18 = sshll.u32 %s84_s17, 6 }
   0xb   : > { %s728_s19 = sshll.u32 %s840_s9, 6  ;;  %s88_s23 = scalar_lea.vmem [#allocation2], %s694_s18 }
   0xc   : > { %s94_s22 = scalar_lea.hbm %s1040_s0, %s728_s19  ;;  %s97_s24 = sshll.u32 %s88_s23, 4  ;;  %s98_s24 = int_to_ptr.vmem [resolvable:$true] %s97_s24 }
   0xd   : > { %s95_s25 = sshll.u32 %s94_s22, 4  ;;  %p910_p8 = pnand %p735_p6, %p892_p4  ;;  %s96_s25 = int_to_ptr.hbm [resolvable:$true] %s95_s25 }
   0xe   : > { %p698_p9 = scmp.ge.s32.totalorder %s840_s9, 1  ;;  %s85_s27 = scalar_lea.sflag [#allocation3], %s84_s17 }
   0xf   : > { %s776_s28 = sshra.s32 %s96_s25, 4  ;;  %p780_p11 = pneg %p910_p8  ;;  %s777_s28 = int_to_ptr.hbm [resolvable:$true] %s776_s28 }
  0x10   : > { %s778_s29 = scalar_lea.hbm %s777_s28, 64  ;;  %s783_s3 = scalar_lea.hbm %s1040_s0, 128 }
  0x11   : > { %p779_p10 = scmp.ne.s32.totalorder %s777_s28, %s778_s29  ;;  %p784_p0 = scmp.lt.s32.totalorder %s777_s28, %s1040_s0 }
  0x12   : > { %p785_p1 = scmp.lt.s32.totalorder %s783_s3, %s778_s29 }
  0x13   : > { %p781_p12 = pnand %p780_p11, %p779_p10 }
  0x14   : > { %p786_p2 = por %p785_p1, %p784_p0 }
  0x15   : > { %p782_p13 = pneg %p781_p12 }
  0x17   : > { %p787_p3 = pnand %p786_p2, %p782_p13 }
  0x19   : > { %790 = shalt.err (!%p787_p3)
}
  0x1a   : > { %s842_s6 = smov 128   ;;  %s843_s12 = smov 8  }
  0x1b   : > { %734 = dma.hbm_to_vmem [thread:$0]  (!%p910_p8), %s96_s25, 1024, %s98_s24, %s85_s27, %s842_s6, %s842_s6, %s843_s12  }
  0x1c   : > { %p105_p4 = scmp.lt.s32.totalorder %s840_s9, 3 }
  0x1e   : > { %p106_p5 = pnand %p698_p9, %p105_p4 }
  0x1f   : > { %s111_s13 = sand.u32 (!%p106_p5), 1, %s832_s7  }
  0x20   : > { %109 = sbr.rel (%p106_p5) target bundleno = 586 (0x24a), region = 24  ;;  %s699_s15 = sshll.u32 (!%p106_p5), %s111_s13, 6 }
  0x21   : > { %s112_s17 = scalar_lea.sflag (!%p106_p5), [#allocation3], %s111_s13  ;;  %s115_s18 = scalar_lea.vmem (!%p106_p5), [#allocation2], %s699_s15 }
  0x25   : > { %823 = dma.done.wait (%p899_p7), %s112_s17, 1024  }
  0x26   : > { %825 = vsyncadd (%p899_p7), %s112_s17, 4294966272  ;;  %v146_v0 = vld [vmem:[%s115_s18 + $0x20] sm:$0xff]  ;;  %v147_v1 = vld [vmem:[%s115_s18 + $0x28] sm:$0xff]  ;;  %s844_s19 = smov 2   ;;  %s845_s20 = smov 1   ;;  %vm206_vm0 = vcmask 130048   ;;  %v296_v40 = vlaneseq }
  0x27   : > { %190 = vrot.lane.b32.xlu1 %v146_v0, %s844_s19  ;;  %166 = vrot.lane.b32.xlu0 %v146_v0, %s845_s20  ;;  %v148_v2 = vld [vmem:[%s115_s18 + $0x30] sm:$0xff]  ;;  %v149_v3 = vld [vmem:[%s115_s18 + $0x38] sm:$0xff]  ;;  %vm215_vm1 = vcmask 138240   ;;  %s846_s16 = smov 126   ;;  %s847_s21 = smov 127   ;;  %v848_v45 = vmov 1.0  }
  0x28   : > { %168 = vrot.lane.b32.xlu2 %v147_v1, %s845_s20  ;;  %v142_v4 = vld [vmem:[%s115_s18] sm:$0xff]  ;;  %v144_v5 = vld [vmem:[%s115_s18 + $0x10] sm:$0xff]  ;;  %v143_v6 = vld [vmem:[%s115_s18 + $0x8] sm:$0xff]  ;;  %v973_v41 = vshrl.u32 %v296_v40, 7  ;;  %v975_v42 = vand.u32 127, %v296_v40  ;;  %vm444_vm4 = vcmask 1040384  }
  0x29   : > { %v145_v7 = vld [vmem:[%s115_s18 + $0x18] sm:$0xff]  ;;  %vm457_vm5 = vcmask 1046528   ;;  %vm494_vm6 = vcmask 1045504   ;;  %s700_s22 = sshll.u32 %s690_s10, 2  ;;  %vm618_vm8 = vcmask 46080  }
  0x2a   : > { %v298_v43 = vadd.s32 8, %v973_v41  ;;  %v301_v44 = vmul.u32 3, %v975_v42  ;;  %p137_p6 = scmp.lt.s32.totalorder %s700_s22, 7 }
  0x2c   : > { %vm303_vm2 = vcmp.eq.s32.totalorder %v298_v43, %v301_v44  ;;  %vm302_vm3 = vcmp.eq.s32.totalorder %v973_v41, %v301_v44  ;;  %s1050_s22 = smov (!%p137_p6, %s700_s22), 7 }
  0x2d   : > { %712 = vmatpush.msk.msra.mxu2 %vm303_vm2, %v848_v45  ;;  %716 = vmatpush.msk.msra.mxu3 %vm303_vm2, %v848_v45  ;;  %s701_s23 = sshll.u32 %s1050_s22, 3 }
  0x2e   : > { %704 = vmatpush.msk.msra.mxu0 %vm303_vm2, %v848_v45  ;;  %708 = vmatpush.msk.msra.mxu1 %vm303_vm2, %v848_v45  ;;  %s140_s26 = scalar_lea.vmem %s1041_s1, %s701_s23 }
  0x2f   : > { %194 = vrot.lane.b32.xlu1 %v148_v2, %s844_s19  ;;  %170 = vrot.lane.b32.xlu0 %v148_v2, %s845_s20 }
  0x30   : > { %172 = vrot.lane.b32.xlu2 %v149_v3, %s845_s20  ;;  %713 = vmatpush.msk.msra.mxu2 %vm302_vm3, %v848_v45 }
  0x31   : > { %717 = vmatpush.msk.msra.mxu3 %vm302_vm3, %v848_v45  ;;  %705 = vmatpush.msk.msra.mxu0 %vm302_vm3, %v848_v45 }
  0x32   : > { %709 = vmatpush.msk.msra.mxu1 %vm302_vm3, %v848_v45 }
  0x37   : > { %192 = vrot.lane.b32.xlu0 %v147_v1, %s844_s19  ;;  %158 = vrot.lane.b32.xlu1 %v142_v4, %s845_s20 }
  0x38   : > { %196 = vrot.lane.b32.xlu2 %v149_v3, %s844_s19 }
  0x3f   : > { %162 = vrot.lane.b32.xlu0 %v144_v5, %s845_s20  ;;  %182 = vrot.lane.b32.xlu1 %v142_v4, %s844_s19 }
  0x40   : > { %186 = vrot.lane.b32.xlu2 %v144_v5, %s844_s19 }
  0x47   : > { %160 = vrot.lane.b32.xlu0 %v143_v6, %s845_s20  ;;  %164 = vrot.lane.b32.xlu1 %v145_v7, %s845_s20 }
  0x48   : > { %184 = vrot.lane.b32.xlu2 %v143_v6, %s844_s19 }
  0x4f   : > { %188 = vrot.lane.b32.xlu0 %v145_v7, %s844_s19 }
  0x82   : > { %v169_v8 = vpop.permute.xlu2 %168 }
  0x83   : > { %v212_v21 = vsel %vm206_vm0, %v147_v1, %v169_v8 }
  0x8a   : > { %v173_v9 = vpop.permute.xlu2 %172 }
  0x8b   : > { %v214_v14 = vsel %vm206_vm0, %v149_v3, %v173_v9 }
  0x92   : > { %v197_v15 = vpop.permute.xlu2 %196 }
  0x93   : > { %v943_v18 = vsel %vm215_vm1, %v214_v14, %v197_v15 }
  0x99   : > { %v191_v10 = vpop.permute.xlu1 %190  ;;  %v167_v11 = vpop.permute.xlu0 %166 }
  0x9a   : > { %v211_v12 = vsel %vm206_vm0, %v146_v0, %v167_v11  ;;  %v187_v25 = vpop.permute.xlu2 %186 }
  0x9b   : > { %v935_v13 = vsel %vm215_vm1, %v211_v12, %v191_v10 }
  0x9c   : > { %272 = vrot.lane.b32.xlu0 %v935_v13, %s846_s16  ;;  %240 = vrot.lane.b32.xlu1 %v935_v13, %s847_s21 }
  0xa1   : > { %v195_v16 = vpop.permute.xlu1 %194  ;;  %v171_v17 = vpop.permute.xlu0 %170 }
  0xa2   : > { %v213_v19 = vsel %vm206_vm0, %v148_v2, %v171_v17  ;;  %v185_v35 = vpop.permute.xlu2 %184 }
  0xa3   : > { %v222_v20 = vsel %vm215_vm1, %v213_v19, %v195_v16 }
  0xa4   : > { %244 = vrot.lane.b32.xlu2 %v222_v20, %s847_s21  ;;  %246 = vrot.lane.b32.xlu0 %v943_v18, %s847_s21 }
  0xa5   : > { %276 = vrot.lane.b32.xlu1 %v222_v20, %s846_s16 }
  0xa9   : > { %v193_v22 = vpop.permute.xlu0 %192  ;;  %v159_v23 = vpop.permute.xlu1 %158 }
  0xaa   : > { %v221_v24 = vsel %vm215_vm1, %v212_v21, %v193_v22  ;;  %v207_v26 = vsel %vm206_vm0, %v142_v4, %v159_v23 }
  0xac   : > { %242 = vrot.lane.b32.xlu2 %v221_v24, %s847_s21 }
  0xb1   : > { %v163_v27 = vpop.permute.xlu0 %162  ;;  %v183_v28 = vpop.permute.xlu1 %182 }
  0xb2   : > { %v209_v29 = vsel %vm206_vm0, %v144_v5, %v163_v27  ;;  %v216_v30 = vsel %vm215_vm1, %v207_v26, %v183_v28 }
  0xb3   : > { %232 = vrot.lane.b32.xlu1 %v216_v30, %s847_s21  ;;  %v218_v31 = vsel %vm215_vm1, %v209_v29, %v187_v25 }
  0xb4   : > { %274 = vrot.lane.b32.xlu2 %v221_v24, %s846_s16  ;;  %236 = vrot.lane.b32.xlu0 %v218_v31, %s847_s21 }
  0xb9   : > { %v161_v32 = vpop.permute.xlu0 %160  ;;  %v165_v33 = vpop.permute.xlu1 %164 }
  0xba   : > { %v208_v34 = vsel %vm206_vm0, %v143_v6, %v161_v32  ;;  %v210_v36 = vsel %vm206_vm0, %v145_v7, %v165_v33 }
  0xbb   : > { %278 = vrot.lane.b32.xlu1 %v943_v18, %s846_s16  ;;  %v217_v37 = vsel %vm215_vm1, %v208_v34, %v185_v35  ;;  %v849_v34 = vmov 0.0  }
  0xbc   : > { %268 = vrot.lane.b32.xlu0 %v218_v31, %s846_s16  ;;  %264 = vrot.lane.b32.xlu2 %v216_v30, %s846_s16 }
  0xc1   : > { %v189_v38 = vpop.permute.xlu0 %188 }
  0xc2   : > { %v219_v39 = vsel %vm215_vm1, %v210_v36, %v189_v38 }
  0xc3   : > { %234 = vrot.lane.b32.xlu1 %v217_v37, %s847_s21 }
  0xc4   : > { %266 = vrot.lane.b32.xlu0 %v217_v37, %s846_s16  ;;  %238 = vrot.lane.b32.xlu2 %v219_v39, %s847_s21 }
  0xcb   : > { %270 = vrot.lane.b32.xlu1 %v219_v39, %s846_s16 }
  0xfe   : > { %v245_v46 = vpop.permute.xlu2 %244 }
  0xff   : > { %v262_v52 = vmax.f32 %v222_v20, %v245_v46 }
 0x106   : > { %v243_v47 = vpop.permute.xlu2 %242 }
 0x107   : > { %v261_v55 = vmax.f32 %v221_v24, %v243_v47  ;;  %v531_v24 = vmul.u32 3, %v973_v41 }
 0x109   : > { %vm532_vm7 = vcmp.eq.s32.totalorder %v975_v42, %v531_v24 }
 0x10a   : > { %v997_v35 = vsel %vm532_vm7, 1.0, %v849_v34 }
 0x10e   : > { %v241_v48 = vpop.permute.xlu1 %240  ;;  %v273_v50 = vpop.permute.xlu0 %272 }
 0x10f   : > { %v260_v49 = vmax.f32 %v935_v13, %v241_v48  ;;  %v275_v53 = vpop.permute.xlu2 %274 }
 0x110   : > { %v293_v57 = vmax.f32 %v261_v55, %v275_v53 }
 0x111   : > { %v292_v51 = vmax.f32 %v260_v49, %v273_v50 }
 0x113   : > { %714 = vmatmul.msk.f32.vlgmr.msra.gmra.mxu2 %vm206_vm0, %v292_v51 }
 0x116   : > { %v247_v58 = vpop.permute.xlu0 %246 }
 0x117   : > { %v277_v54 = vpop.permute.xlu1 %276  ;;  %v265_v62 = vpop.permute.xlu2 %264  ;;  %v263_v0 = vmax.f32 %v943_v18, %v247_v58 }
 0x118   : > { %v294_v56 = vmax.f32 %v262_v52, %v277_v54 }
 0x11a   : > { %718 = vmatmul.msk.f32.vlgmr.msra.gmra.mxu3 %vm206_vm0, %v294_v56 }
 0x11b   : > { %715 = vmatmul.msk.f32.gmra.mxu2 %vm206_vm0, %v293_v57 }
 0x11f   : > { %v239_v10 = vpop.permute.xlu2 %238 }
 0x120   : > { %v259_v11 = vmax.f32 %v219_v39, %v239_v10 }
 0x125   : > { %v233_v59 = vpop.permute.xlu1 %232 }
 0x126   : > { %v256_v60 = vmax.f32 %v216_v30, %v233_v59  ;;  %v237_v61 = vpop.permute.xlu0 %236 }
 0x127   : > { %v258_v1 = vmax.f32 %v218_v31, %v237_v61 }
 0x128   : > { %v288_v63 = vmax.f32 %v256_v60, %v265_v62 }
 0x12a   : > { %706 = vmatmul.msk.f32.vlgmr.msra.gmra.mxu0 %vm206_vm0, %v288_v63 }
 0x12d   : > { %v279_v2 = vpop.permute.xlu1 %278 }
 0x12e   : > { %v295_v3 = vmax.f32 %v263_v0, %v279_v2  ;;  %v269_v4 = vpop.permute.xlu0 %268 }
 0x12f   : > { %v290_v5 = vmax.f32 %v258_v1, %v269_v4 }
 0x130   : > { %719 = vmatmul.msk.f32.gmra.mxu3 %vm206_vm0, %v295_v3 }
 0x131   : > { %710 = vmatmul.msk.f32.vlgmr.msra.gmra.mxu1 %vm206_vm0, %v290_v5 }
 0x135   : > { %v235_v6 = vpop.permute.xlu1 %234 }
 0x136   : > { %v257_v7 = vmax.f32 %v217_v37, %v235_v6  ;;  %v267_v8 = vpop.permute.xlu0 %266 }
 0x138   : > { %v289_v9 = vmax.f32 %v257_v7, %v267_v8 }
 0x13a   : > { %707 = vmatmul.msk.f32.gmra.mxu0 %vm206_vm0, %v289_v9 }
 0x13d   : > { %v271_v12 = vpop.permute.xlu1 %270 }
 0x13e   : > { %v291_v13 = vmax.f32 %v259_v11, %v271_v12 }
 0x140   : > { %711 = vmatmul.msk.f32.gmra.mxu1 %vm206_vm0, %v291_v13 }
 0x196   : > { %v389_v14 = vpop.f32.mrf.mxu2 }
 0x197   : > { %v468_v19 = vrot.slane %v389_v14, 1  ;;  %v505_v29 = vrot.slane %v389_v14, 2 }
 0x19d   : > { %v418_v36 = vpop.f32.mrf.mxu3 }
 0x19e   : > { %v392_v15 = vpop.f32.mrf.mxu2  ;;  %v473_v39 = vrot.slane %v418_v36, 1  ;;  %v510_v56 = vrot.slane %v418_v36, 2 }
 0x19f   : > { %v430_v16 = vrot.slane %v392_v15, 7  ;;  %v438_v17 = vrot.slane %v392_v15, 6  ;;  %v469_v18 = vrot.slane %v392_v15, 1  ;;  %v506_v26 = vrot.slane %v392_v15, 2 }
 0x1a1   : > { %v447_v20 = vsel %vm444_vm4, %v430_v16, %v438_v17  ;;  %v470_v23 = vsel %vm457_vm5, %v468_v19, %v469_v18  ;;  %v507_v32 = vsel %vm494_vm6, %v505_v29, %v506_v26 }
 0x1a2   : > { %v471_v21 = vrot.slane %v447_v20, 1  ;;  %v508_v22 = vrot.slane %v447_v20, 2  ;;  %v490_v28 = vmax.f32 %v389_v14, %v470_v23 }
 0x1a4   : > { %v472_v25 = vsel %vm457_vm5, %v469_v18, %v471_v21  ;;  %v509_v30 = vsel %vm494_vm6, %v506_v26, %v508_v22  ;;  %v527_v33 = vmax.f32 %v490_v28, %v507_v32 }
 0x1a5   : > { %v491_v27 = vmax.f32 %v392_v15, %v472_v25 }
 0x1a7   : > { %v528_v31 = vmax.f32 %v491_v27, %v509_v30  ;;  %v331_v37 = vpop.f32.mrf.mxu0 }
 0x1a8   : > { %v458_v46 = vrot.slane %v331_v37, 1  ;;  %v495_v10 = vrot.slane %v331_v37, 2 }
 0x1a9   : > { %592 = vmatpush.msrb.mxu2 %v528_v31 }
 0x1ab   : > { %593 = vmatpush.msrb.mxu2 %v527_v33 }
 0x1ac   : > { %723 = vmatmul.msk.f32.vlgmr.msrb.gmra.mxu2 %vm206_vm0, %v997_v35 }
 0x1ae   : > { %v360_v42 = vpop.f32.mrf.mxu1 }
 0x1af   : > { %v463_v11 = vrot.slane %v360_v42, 1  ;;  %v500_v24 = vrot.slane %v360_v42, 2 }
 0x1b3   : > { %v421_v38 = vpop.f32.mrf.mxu3 }
 0x1b4   : > { %v431_v40 = vrot.slane %v421_v38, 7  ;;  %v439_v41 = vrot.slane %v421_v38, 6  ;;  %v474_v43 = vrot.slane %v421_v38, 1  ;;  %v511_v53 = vrot.slane %v421_v38, 2 }
 0x1b6   : > { %v448_v44 = vsel %vm444_vm4, %v431_v40, %v439_v41  ;;  %v475_v45 = vsel %vm457_vm5, %v473_v39, %v474_v43  ;;  %v512_v0 = vsel %vm494_vm6, %v510_v56, %v511_v53 }
 0x1b7   : > { %v334_v47 = vpop.f32.mrf.mxu0  ;;  %v476_v48 = vrot.slane %v448_v44, 1  ;;  %v513_v49 = vrot.slane %v448_v44, 2  ;;  %v492_v55 = vmax.f32 %v418_v36, %v475_v45 }
 0x1b8   : > { %v428_v50 = vrot.slane %v334_v47, 7  ;;  %v436_v51 = vrot.slane %v334_v47, 6  ;;  %v459_v52 = vrot.slane %v334_v47, 1  ;;  %v496_v4 = vrot.slane %v334_v47, 2 }
 0x1b9   : > { %v477_v54 = vsel %vm457_vm5, %v474_v43, %v476_v48  ;;  %v514_v60 = vsel %vm494_vm6, %v511_v53, %v513_v49  ;;  %v529_v2 = vmax.f32 %v492_v55, %v512_v0 }
 0x1ba   : > { %v493_v57 = vmax.f32 %v421_v38, %v477_v54  ;;  %v445_v58 = vsel %vm444_vm4, %v428_v50, %v436_v51  ;;  %v460_v59 = vsel %vm457_vm5, %v458_v46, %v459_v52  ;;  %v497_v15 = vsel %vm494_vm6, %v495_v10, %v496_v4 }
 0x1bb   : > { %v461_v61 = vrot.slane %v445_v58, 1  ;;  %v498_v62 = vrot.slane %v445_v58, 2  ;;  %v486_v5 = vmax.f32 %v331_v37, %v460_v59 }
 0x1bc   : > { %v530_v63 = vmax.f32 %v493_v57, %v514_v60 }
 0x1bd   : > { %v363_v1 = vpop.f32.mrf.mxu1  ;;  %v462_v3 = vsel %vm457_vm5, %v459_v52, %v461_v61  ;;  %v499_v12 = vsel %vm494_vm6, %v496_v4, %v498_v62  ;;  %v523_v19 = vmax.f32 %v486_v5, %v497_v15 }
 0x1be   : > { %v429_v6 = vrot.slane %v363_v1, 7  ;;  %v437_v7 = vrot.slane %v363_v1, 6  ;;  %v464_v8 = vrot.slane %v363_v1, 1  ;;  %612 = vmatpush.msrb.mxu3 %v530_v63  ;;  %v487_v9 = vmax.f32 %v334_v47, %v462_v3 }
 0x1bf   : > { %v501_v21 = vrot.slane %v363_v1, 2 }
 0x1c0   : > { %613 = vmatpush.msrb.mxu3 %v529_v2  ;;  %v524_v13 = vmax.f32 %v487_v9, %v499_v12  ;;  %v446_v14 = vsel %vm444_vm4, %v429_v6, %v437_v7  ;;  %v465_v18 = vsel %vm457_vm5, %v463_v11, %v464_v8 }
 0x1c1   : > { %v466_v16 = vrot.slane %v446_v14, 1  ;;  %v503_v17 = vrot.slane %v446_v14, 2  ;;  %724 = vmatmul.msk.f32.vlgmr.msrb.gmra.mxu3 %vm206_vm0, %v997_v35  ;;  %v488_v23 = vmax.f32 %v360_v42, %v465_v18  ;;  %v502_v27 = vsel %vm494_vm6, %v500_v24, %v501_v21 }
 0x1c2   : > { %552 = vmatpush.msrb.mxu0 %v524_v13 }
 0x1c3   : > { %v467_v20 = vsel %vm457_vm5, %v464_v8, %v466_v16  ;;  %v504_v25 = vsel %vm494_vm6, %v501_v21, %v503_v17  ;;  %v525_v28 = vmax.f32 %v488_v23, %v502_v27 }
 0x1c4   : > { %553 = vmatpush.msrb.mxu0 %v523_v19  ;;  %v489_v22 = vmax.f32 %v363_v1, %v467_v20 }
 0x1c5   : > { %721 = vmatmul.msk.f32.vlgmr.msrb.gmra.mxu0 %vm206_vm0, %v997_v35 }
 0x1c6   : > { %v526_v26 = vmax.f32 %v489_v22, %v504_v25 }
 0x1c8   : > { %572 = vmatpush.msrb.mxu1 %v526_v26 }
 0x1ca   : > { %573 = vmatpush.msrb.mxu1 %v525_v28 }
 0x1cb   : > { %722 = vmatmul.msk.f32.vlgmr.msrb.gmra.mxu1 %vm206_vm0, %v997_v35 }
 0x22f   : > { %v595_v30 = vpop.f32.mrf.mxu2 }
 0x230   : > { %621 = vst.msk [vmem:[%s140_s26 + $0x10] sm:$0x3f] %vm618_vm8, %v595_v30 }
 0x242   : > { %v555_v29 = vpop.f32.mrf.mxu0 }
 0x243   : > { %619 = vst.msk [vmem:[%s140_s26] sm:$0x3f] %vm618_vm8, %v555_v29 }
 0x244   : > { %v615_v32 = vpop.f32.mrf.mxu3 }
 0x245   : > { %622 = vst.msk [vmem:[%s140_s26 + $0x18] sm:$0x3f] %vm618_vm8, %v615_v32 }
 0x248   : > { %v575_v31 = vpop.f32.mrf.mxu1 }
 0x249   : > { %620 = vst.msk [vmem:[%s140_s26 + $0x8] sm:$0x3f] %vm618_vm8, %v575_v31 }
 0x24a PF: > { %p11_p7 = scmp.ge.s32.totalorder %s880_s11, 4   ;;  %s1045_s6 = smov %s832_s7 }
 0x24b   : > { %s1046_s7 = smov %s836_s8  ;;  %s1047_s8 = smov %s890_s14 }
 0x24c   : > { %s1048_s9 = smov %s880_s11  ;;  %13 = sbr.rel (!%p11_p7) target bundleno = 3 (0x3), region = 64 }
 0x251   :  { %645 = vsyncpa [#allocation3], 1 }
 0x252   :  { %647 = vsyncpa [#allocation3 + $0x1], 1 }

</bundles_post_ra>
